<compile_context>
chip_gen: v6e
topology: v6e:2x2x1
jax: 0.10.0
libtpu: 0.0.40
codegen_flags: <defaults>
</compile_context>

<pallas_src>
import functools

import jax
import jax.numpy as jnp
from jax.experimental import pallas as pl
from jax.experimental.pallas import tpu as pltpu

N_INPUT, N_H1, N_H2, N_H3, N_H4, N_OUT = 11, 300, 75, 38, 18, 6
LAYER_DIMS = [(N_INPUT, N_H1), (N_H1, N_H2), (N_H2, N_H3),
              (N_H3, N_H4), (N_H4, N_OUT)]


def mlp_kernel(x_ref,
               w1_ref, b1_ref, w2_ref, b2_ref, w3_ref, b3_ref,
               w4_ref, b4_ref, w5_ref, b5_ref,
               o_ref, *, elem_dtype):
    """One batch tile of the fused MLP.

    x_ref : [TILE_B, N_INPUT] bf16  (untransposed; layer 1 contracts axis 1 of
                                     both W1 and x, so activations come out
                                     lane-dense as [features, TILE_B])
    wK_ref: [out_feat, in_feat] bf16 (native PyTorch layout, VMEM-resident)
    bK_ref: [out_feat, 1]       f32
    o_ref : [N_OUT, TILE_B]     f32  (lane-dense -> unmasked vector stores)
    """
    use_bf16_vpu = jnp.dtype(elem_dtype) == jnp.dtype(jnp.bfloat16)

    def bias_relu(a_f32, b_ref):
        # a_f32: [out, TILE_B] f32 MXU output.  Returns bf16 for the next matmul.
        if use_bf16_vpu:  # bf16 VALU (v6e/v7x): halves VPU + vld/vst traffic
            a = a_f32.astype(jnp.bfloat16) + b_ref[...].astype(jnp.bfloat16)
            return jnp.maximum(a, 0)
        a = jnp.maximum(a_f32 + b_ref[...], 0.0)
        return a.astype(jnp.bfloat16)

    # Layer 1: contract the feature axis of both operands (== W1 @ x.T).
    a = jax.lax.dot_general(
        w1_ref[...], x_ref[...],
        dimension_numbers=(((1,), (1,)), ((), ())),
        preferred_element_type=jnp.float32)               # [N_H1, TILE_B]
    h = bias_relu(a, b1_ref)

    # Layers 2-4: W @ h with lane-dense [in, TILE_B] activations.
    for w_ref, b_ref in ((w2_ref, b2_ref), (w3_ref, b3_ref), (w4_ref, b4_ref)):
        a = jnp.dot(w_ref[...], h, preferred_element_type=jnp.float32)
        h = bias_relu(a, b_ref)

    # Final layer: no ReLU, keep f32.
    a = jnp.dot(w5_ref[...], h, preferred_element_type=jnp.float32)
    o_ref[...] = a + b5_ref[...]


def _round_up(n, m):
    return ((n + m - 1) // m) * m


def _elemwise_dtype():
    """bf16 bias/ReLU on chips with a bf16 VPU (v6e/v7x); f32 otherwise."""
    try:
        kind = jax.devices()[0].device_kind.lower()
    except Exception:
        return jnp.float32
    if ("v6" in kind) or ("v7" in kind) or ("7x" in kind):
        return jnp.bfloat16
    return jnp.float32


def _choose_tile_b(batch, tile_b):
    # Lane-align and bound by VMEM (<= 4096 keeps the kernel ~12 MB worst
    # case, under the 32 MiB limit we request and v5e's raised default).
    tile_b = max(128, _round_up(tile_b, 128))
    tile_b = min(tile_b, 4096)
    # Don't over-pad tiny batches.
    tile_b = min(tile_b, _round_up(batch, 128))
    # v7x megacore: guarantee >= 2 grid steps once batch >= 256 so
    # dimension_semantics=("parallel",) shards across both TensorCores.
    if batch >= 256:
        tile_b = min(tile_b, _round_up(batch, 256) // 2)
    return tile_b


def net_forward(x, params, *, tile_b=2048, elem_dtype=None):
    """x: f32[B, N_INPUT] -> f32[B, N_OUT].

    params: flat list [W1, b1, ..., W5, b5] with Wk bf16 (out, in), bk f32
    (out, 1).  tile_b is rounded to a multiple of 128; sweep 1024-4096 for
    peak throughput (default 2048 is safe on v5e/v6e/v7x VMEM budgets).
    """
    if elem_dtype is None:
        elem_dtype = _elemwise_dtype()

    batch = x.shape[0]
    tile_b = _choose_tile_b(batch, tile_b)
    b_pad = _round_up(batch, tile_b)

    # Single pass over x: bf16 cast fused with the batch pad.  No transpose —
    # the kernel's first matmul contracts the feature axis of both operands.
    x_p = jnp.pad(x.astype(jnp.bfloat16), ((0, b_pad - batch), (0, 0)))

    grid = (b_pad // tile_b,)
    in_specs = [pl.BlockSpec((tile_b, N_INPUT), lambda i: (i, 0))]
    # Weights / biases: full-array blocks, resident across all grid steps.
    for p in params:
        in_specs.append(pl.BlockSpec(p.shape, lambda i: (0, 0)))

    flops = 2 * sum(fi * fo for fi, fo in LAYER_DIMS) * b_pad
    w_bytes = int(sum(int(p.size) * p.dtype.itemsize for p in params))
    cost = pl.CostEstimate(
        flops=flops,
        transcendentals=0,
        bytes_accessed=b_pad * (N_INPUT * 2 + N_OUT * 4) + w_bytes)

    out_t = pl.pallas_call(
        functools.partial(mlp_kernel, elem_dtype=elem_dtype),
        out_shape=jax.ShapeDtypeStruct((N_OUT, b_pad), jnp.float32),
        grid=grid,
        in_specs=in_specs,
        out_specs=pl.BlockSpec((N_OUT, tile_b), lambda i: (0, i)),
        compiler_params=pltpu.CompilerParams(
            dimension_semantics=("parallel",),          # megacore on v7x
            vmem_limit_bytes=32 * 1024 * 1024),         # safe on v5e/v6e/v7x
        cost_estimate=cost,
    )(x_p, *params)

    # Output is tiny (6 x B f32); slice off batch padding and untranspose.
    return out_t[:, :batch].T                            # [B, N_OUT] f32


def init_params(key):
    """PyTorch nn.Linear default init: U(-1/sqrt(fan_in), +1/sqrt(fan_in)).

    Weights kept in native torch layout (out_features, in_features), cast to
    bf16 once (MXU inputs); biases kept f32 as (out_features, 1).
    """
    params = []
    for fan_in, fan_out in LAYER_DIMS:
        key, kw, kb = jax.random.split(key, 3)
        bound = 1.0 / (fan_in ** 0.5)
        w = jax.random.uniform(kw, (fan_out, fan_in), jnp.float32, -bound, bound)
        b = jax.random.uniform(kb, (fan_out, 1), jnp.float32, -bound, bound)
        params += [w.astype(jnp.bfloat16), b]
    return params


def reference_forward(x, params, elem_dtype=jnp.float32):
    """Pure-JAX reference with the same bf16-matmul / f32-accumulate recipe
    (and the same elementwise dtype as the kernel for apples-to-apples)."""
    use_bf16 = jnp.dtype(elem_dtype) == jnp.dtype(jnp.bfloat16)
    h = x.astype(jnp.bfloat16)
    n_layers = len(params) // 2
    for l in range(n_layers):
        w, b = params[2 * l], params[2 * l + 1]
        a = jnp.dot(h, w.T, preferred_element_type=jnp.float32)
        if l == n_layers - 1:
            return a + b[:, 0]
        if use_bf16:
            h = jnp.maximum(a.astype(jnp.bfloat16) + b[:, 0].astype(jnp.bfloat16), 0)
        else:
            h = jnp.maximum(a + b[:, 0], 0.0).astype(jnp.bfloat16)


if __name__ == "__main__":
    key = jax.random.PRNGKey(0)
    key, kx = jax.random.split(key)
    params = init_params(key)
    elem_dtype = _elemwise_dtype()

    # Small test: single batch tile (batch padded up to one 128-row tile).
    x_small = jax.random.normal(kx, (8, N_INPUT), jnp.float32)
    out_small = jax.block_until_ready(
        net_forward(x_small, params, elem_dtype=elem_dtype))
    ref_small = reference_forward(x_small, params, elem_dtype)
    assert out_small.shape == (8, N_OUT)
    assert jnp.allclose(out_small, ref_small, atol=2e-2, rtol=2e-2), \
        "mismatch vs reference (small batch)"

    # Multi-tile test: batch=300 -> tile_b capped at 256 (>=2 grid steps for
    # v7x megacore), exercises the batch grid + tail-padding path.
    key, kx2 = jax.random.split(key)
    x_multi = jax.random.normal(kx2, (300, N_INPUT), jnp.float32)
    out_multi = jax.block_until_ready(
        net_forward(x_multi, params, elem_dtype=elem_dtype))
    ref_multi = reference_forward(x_multi, params, elem_dtype)
    assert out_multi.shape == (300, N_OUT)
    assert jnp.allclose(out_multi, ref_multi, atol=2e-2, rtol=2e-2), \
        "mismatch vs reference (multi tile)"

    print("KERNEL_OK")
</pallas_src>

<mosaic_0001>
module attributes {stable_mosaic.version = 11 : i64} {
  func.func @mlp_kernel(%arg0: i32, %arg1: memref<128x11xbf16, #tpu.memory_space<vmem>>, %arg2: memref<300x11xbf16, #tpu.memory_space<vmem>>, %arg3: memref<300x1xf32, #tpu.memory_space<vmem>>, %arg4: memref<75x300xbf16, #tpu.memory_space<vmem>>, %arg5: memref<75x1xf32, #tpu.memory_space<vmem>>, %arg6: memref<38x75xbf16, #tpu.memory_space<vmem>>, %arg7: memref<38x1xf32, #tpu.memory_space<vmem>>, %arg8: memref<18x38xbf16, #tpu.memory_space<vmem>>, %arg9: memref<18x1xf32, #tpu.memory_space<vmem>>, %arg10: memref<6x18xbf16, #tpu.memory_space<vmem>>, %arg11: memref<6x1xf32, #tpu.memory_space<vmem>>, %arg12: memref<6x128xf32, #tpu.memory_space<vmem>>) attributes {dimension_semantics = [#tpu.dimension_semantics<parallel>], iteration_bounds = array<i64: 1>, scalar_prefetch = 0 : i64, scratch_operands = 0 : i64, tpu.core_type = #tpu.core_type<tc>, window_params = [{transform_indices = @transform_0, window_bounds = array<i64: 128, 11>}, {pipeline_mode = #tpu.pipeline_mode<synchronous>, transform_indices = @transform_1, window_bounds = array<i64: 300, 11>}, {pipeline_mode = #tpu.pipeline_mode<synchronous>, transform_indices = @transform_2, window_bounds = array<i64: 300, 1>}, {pipeline_mode = #tpu.pipeline_mode<synchronous>, transform_indices = @transform_3, window_bounds = array<i64: 75, 300>}, {pipeline_mode = #tpu.pipeline_mode<synchronous>, transform_indices = @transform_4, window_bounds = array<i64: 75, 1>}, {pipeline_mode = #tpu.pipeline_mode<synchronous>, transform_indices = @transform_5, window_bounds = array<i64: 38, 75>}, {pipeline_mode = #tpu.pipeline_mode<synchronous>, transform_indices = @transform_6, window_bounds = array<i64: 38, 1>}, {pipeline_mode = #tpu.pipeline_mode<synchronous>, transform_indices = @transform_7, window_bounds = array<i64: 18, 38>}, {pipeline_mode = #tpu.pipeline_mode<synchronous>, transform_indices = @transform_8, window_bounds = array<i64: 18, 1>}, {pipeline_mode = #tpu.pipeline_mode<synchronous>, transform_indices = @transform_9, window_bounds = array<i64: 6, 18>}, {pipeline_mode = #tpu.pipeline_mode<synchronous>, transform_indices = @transform_10, window_bounds = array<i64: 6, 1>}, {transform_indices = @transform_11, window_bounds = array<i64: 6, 128>}]} {
    %c0 = arith.constant 0 : index
    %c0_0 = arith.constant 0 : index
    %0 = vector.load %arg2[%c0, %c0_0] : memref<300x11xbf16, #tpu.memory_space<vmem>>, vector<300x11xbf16>
    %c0_1 = arith.constant 0 : index
    %c0_2 = arith.constant 0 : index
    %1 = vector.load %arg1[%c0_1, %c0_2] : memref<128x11xbf16, #tpu.memory_space<vmem>>, vector<128x11xbf16>
    %cst = arith.constant dense<0.000000e+00> : vector<300x128xf32>
    %2 = tpu.matmul %0, %1, %cst {dimension_numbers = #tpu.dot_dimension_numbers<[1], [1], [0], [0], [0, 0, 1, 0], [], []>} : vector<300x11xbf16>, vector<128x11xbf16>, vector<300x128xf32> -> vector<300x128xf32>
    %c0_3 = arith.constant 0 : index
    %c0_4 = arith.constant 0 : index
    %3 = vector.load %arg3[%c0_3, %c0_4] : memref<300x1xf32, #tpu.memory_space<vmem>>, vector<300x1xf32>
    %4 = vector.broadcast %3 : vector<300x1xf32> to vector<300x128xf32>
    %5 = arith.addf %2, %4 : vector<300x128xf32>
    %cst_5 = arith.constant 0.000000e+00 : f32
    %6 = vector.broadcast %cst_5 : f32 to vector<300x128xf32>
    %7 = arith.maximumf %5, %6 : vector<300x128xf32>
    %8 = arith.truncf %7 : vector<300x128xf32> to vector<300x128xbf16>
    %c0_6 = arith.constant 0 : index
    %c0_7 = arith.constant 0 : index
    %9 = vector.load %arg4[%c0_6, %c0_7] : memref<75x300xbf16, #tpu.memory_space<vmem>>, vector<75x300xbf16>
    %cst_8 = arith.constant dense<0.000000e+00> : vector<75x128xf32>
    %10 = tpu.matmul %9, %8, %cst_8 {dimension_numbers = #tpu.dot_dimension_numbers<[1], [0], [0], [1], [0, 0, 1, 1], [], []>} : vector<75x300xbf16>, vector<300x128xbf16>, vector<75x128xf32> -> vector<75x128xf32>
    %c0_9 = arith.constant 0 : index
    %c0_10 = arith.constant 0 : index
    %11 = vector.load %arg5[%c0_9, %c0_10] : memref<75x1xf32, #tpu.memory_space<vmem>>, vector<75x1xf32>
    %12 = vector.broadcast %11 : vector<75x1xf32> to vector<75x128xf32>
    %13 = arith.addf %10, %12 : vector<75x128xf32>
    %cst_11 = arith.constant 0.000000e+00 : f32
    %14 = vector.broadcast %cst_11 : f32 to vector<75x128xf32>
    %15 = arith.maximumf %13, %14 : vector<75x128xf32>
    %16 = arith.truncf %15 : vector<75x128xf32> to vector<75x128xbf16>
    %c0_12 = arith.constant 0 : index
    %c0_13 = arith.constant 0 : index
    %17 = vector.load %arg6[%c0_12, %c0_13] : memref<38x75xbf16, #tpu.memory_space<vmem>>, vector<38x75xbf16>
    %cst_14 = arith.constant dense<0.000000e+00> : vector<38x128xf32>
    %18 = tpu.matmul %17, %16, %cst_14 {dimension_numbers = #tpu.dot_dimension_numbers<[1], [0], [0], [1], [0, 0, 1, 1], [], []>} : vector<38x75xbf16>, vector<75x128xbf16>, vector<38x128xf32> -> vector<38x128xf32>
    %c0_15 = arith.constant 0 : index
    %c0_16 = arith.constant 0 : index
    %19 = vector.load %arg7[%c0_15, %c0_16] : memref<38x1xf32, #tpu.memory_space<vmem>>, vector<38x1xf32>
    %20 = vector.broadcast %19 : vector<38x1xf32> to vector<38x128xf32>
    %21 = arith.addf %18, %20 : vector<38x128xf32>
    %cst_17 = arith.constant 0.000000e+00 : f32
    %22 = vector.broadcast %cst_17 : f32 to vector<38x128xf32>
    %23 = arith.maximumf %21, %22 : vector<38x128xf32>
    %24 = arith.truncf %23 : vector<38x128xf32> to vector<38x128xbf16>
    %c0_18 = arith.constant 0 : index
    %c0_19 = arith.constant 0 : index
    %25 = vector.load %arg8[%c0_18, %c0_19] : memref<18x38xbf16, #tpu.memory_space<vmem>>, vector<18x38xbf16>
    %cst_20 = arith.constant dense<0.000000e+00> : vector<18x128xf32>
    %26 = tpu.matmul %25, %24, %cst_20 {dimension_numbers = #tpu.dot_dimension_numbers<[1], [0], [0], [1], [0, 0, 1, 1], [], []>} : vector<18x38xbf16>, vector<38x128xbf16>, vector<18x128xf32> -> vector<18x128xf32>
    %c0_21 = arith.constant 0 : index
    %c0_22 = arith.constant 0 : index
    %27 = vector.load %arg9[%c0_21, %c0_22] : memref<18x1xf32, #tpu.memory_space<vmem>>, vector<18x1xf32>
    %28 = vector.broadcast %27 : vector<18x1xf32> to vector<18x128xf32>
    %29 = arith.addf %26, %28 : vector<18x128xf32>
    %cst_23 = arith.constant 0.000000e+00 : f32
    %30 = vector.broadcast %cst_23 : f32 to vector<18x128xf32>
    %31 = arith.maximumf %29, %30 : vector<18x128xf32>
    %32 = arith.truncf %31 : vector<18x128xf32> to vector<18x128xbf16>
    %c0_24 = arith.constant 0 : index
    %c0_25 = arith.constant 0 : index
    %33 = vector.load %arg10[%c0_24, %c0_25] : memref<6x18xbf16, #tpu.memory_space<vmem>>, vector<6x18xbf16>
    %cst_26 = arith.constant dense<0.000000e+00> : vector<6x128xf32>
    %34 = tpu.matmul %33, %32, %cst_26 {dimension_numbers = #tpu.dot_dimension_numbers<[1], [0], [0], [1], [0, 0, 1, 1], [], []>} : vector<6x18xbf16>, vector<18x128xbf16>, vector<6x128xf32> -> vector<6x128xf32>
    %c0_27 = arith.constant 0 : index
    %c0_28 = arith.constant 0 : index
    %35 = vector.load %arg11[%c0_27, %c0_28] : memref<6x1xf32, #tpu.memory_space<vmem>>, vector<6x1xf32>
    %36 = vector.broadcast %35 : vector<6x1xf32> to vector<6x128xf32>
    %37 = arith.addf %34, %36 : vector<6x128xf32>
    %c0_29 = arith.constant 0 : index
    %c0_30 = arith.constant 0 : index
    %38 = vector.load %arg12[%c0_29, %c0_30] : memref<6x128xf32, #tpu.memory_space<vmem>>, vector<6x128xf32>
    tpu.vector_store %arg12[%c0_29, %c0_30], %37 {strides = array<i32>} : memref<6x128xf32, #tpu.memory_space<vmem>>, vector<6x128xf32>,
    return
  }
  func.func @transform_0(%arg0: i32) -> (i32, i32) {
    %c0_i32 = arith.constant 0 : i32
    %c0_i32_0 = arith.constant 0 : i32
    return %arg0, %c0_i32 : i32, i32
  }
  func.func @transform_1(%arg0: i32) -> (i32, i32) {
    %c0_i32 = arith.constant 0 : i32
    %c0_i32_0 = arith.constant 0 : i32
    %c0_i32_1 = arith.constant 0 : i32
    return %c0_i32, %c0_i32_0 : i32, i32
  }
  func.func @transform_2(%arg0: i32) -> (i32, i32) {
    %c0_i32 = arith.constant 0 : i32
    %c0_i32_0 = arith.constant 0 : i32
    %c0_i32_1 = arith.constant 0 : i32
    return %c0_i32, %c0_i32_0 : i32, i32
  }
  func.func @transform_3(%arg0: i32) -> (i32, i32) {
    %c0_i32 = arith.constant 0 : i32
    %c0_i32_0 = arith.constant 0 : i32
    %c0_i32_1 = arith.constant 0 : i32
    return %c0_i32, %c0_i32_0 : i32, i32
  }
  func.func @transform_4(%arg0: i32) -> (i32, i32) {
    %c0_i32 = arith.constant 0 : i32
    %c0_i32_0 = arith.constant 0 : i32
    %c0_i32_1 = arith.constant 0 : i32
    return %c0_i32, %c0_i32_0 : i32, i32
  }
  func.func @transform_5(%arg0: i32) -> (i32, i32) {
    %c0_i32 = arith.constant 0 : i32
    %c0_i32_0 = arith.constant 0 : i32
    %c0_i32_1 = arith.constant 0 : i32
    return %c0_i32, %c0_i32_0 : i32, i32
  }
  func.func @transform_6(%arg0: i32) -> (i32, i32) {
    %c0_i32 = arith.constant 0 : i32
    %c0_i32_0 = arith.constant 0 : i32
    %c0_i32_1 = arith.constant 0 : i32
    return %c0_i32, %c0_i32_0 : i32, i32
  }
  func.func @transform_7(%arg0: i32) -> (i32, i32) {
    %c0_i32 = arith.constant 0 : i32
    %c0_i32_0 = arith.constant 0 : i32
    %c0_i32_1 = arith.constant 0 : i32
    return %c0_i32, %c0_i32_0 : i32, i32
  }
  func.func @transform_8(%arg0: i32) -> (i32, i32) {
    %c0_i32 = arith.constant 0 : i32
    %c0_i32_0 = arith.constant 0 : i32
    %c0_i32_1 = arith.constant 0 : i32
    return %c0_i32, %c0_i32_0 : i32, i32
  }
  func.func @transform_9(%arg0: i32) -> (i32, i32) {
    %c0_i32 = arith.constant 0 : i32
    %c0_i32_0 = arith.constant 0 : i32
    %c0_i32_1 = arith.constant 0 : i32
    return %c0_i32, %c0_i32_0 : i32, i32
  }
  func.func @transform_10(%arg0: i32) -> (i32, i32) {
    %c0_i32 = arith.constant 0 : i32
    %c0_i32_0 = arith.constant 0 : i32
    %c0_i32_1 = arith.constant 0 : i32
    return %c0_i32, %c0_i32_0 : i32, i32
  }
  func.func @transform_11(%arg0: i32) -> (i32, i32) {
    %c0_i32 = arith.constant 0 : i32
    %c0_i32_0 = arith.constant 0 : i32
    return %c0_i32, %arg0 : i32, i32
  }
}

</mosaic_0001>

<bundles_post_ra>
// kernel: tpu_custom_call.1
= control target key start
LH: loop header
LB: loop body
LE: loop exit
PB: predicated region body
PF: predicated region fallthrough
CT: control target
= control target key end

     0   :  { %v1822_v1 = vmov 0.0   ;;  %vm457_vm0 = vcmask 89088   ;;  %vm1823_vm1 = vmmov 0   ;;  %v1824_v5 = vmov 0   ;;  %s2415_s0 = inlined_call_operand.vmem [shape: bf16[128,11], index: 0, kind: input, shape index: {}]   ;;  %s2416_s1 = inlined_call_operand.vmem [shape: bf16[300,11], index: 1, kind: input, shape index: {}]   ;;  %s2417_s2 = inlined_call_operand.vmem [shape: f32[300,1], index: 2, kind: input, shape index: {}]   ;;  %s2418_s3 = inlined_call_operand.vmem [shape: bf16[75,300], index: 3, kind: input, shape index: {}]   ;;  %s2419_s4 = inlined_call_operand.vmem [shape: f32[75,1], index: 4, kind: input, shape index: {}]   ;;  %s2420_s5 = inlined_call_operand.vmem [shape: bf16[38,75], index: 5, kind: input, shape index: {}]   ;;  %s2421_s6 = inlined_call_operand.vmem [shape: f32[38,1], index: 6, kind: input, shape index: {}]   ;;  %s2422_s7 = inlined_call_operand.vmem [shape: bf16[18,38], index: 7, kind: input, shape index: {}]   ;;  %s2423_s8 = inlined_call_operand.vmem [shape: f32[18,1], index: 8, kind: input, shape index: {}]   ;;  %s2424_s9 = inlined_call_operand.vmem [shape: bf16[6,18], index: 9, kind: input, shape index: {}]   ;;  %s2425_s10 = inlined_call_operand.vmem [shape: f32[6,1], index: 10, kind: input, shape index: {}]   ;;  %s2426_s11 = inlined_call_operand.hbm [shape: f32[6,128], index: 11, kind: output, shape index: {}]  }
   0x1   :  { %v1748_v0 = vld [vmem:[%s2415_s0 + $0x38] sm:$0xff]   ;;  %1582 = vmatprep.subr.bf16.mxu0 %v1822_v1  ;;  %v1749_v3 = vld [vmem:[%s2415_s0 + $0x30] sm:$0xff]   ;;  %1598 = vmatprep.mubr.msk.bf16.mxu0 %vm1823_vm1, %v1822_v1  ;;  %v1750_v8 = vld [vmem:[%s2415_s0 + $0x28] sm:$0xff]  }
   0x2   :  { %v537_v2 = vsel %vm457_vm0, %v1748_v0, 0  ;;  %v534_v4 = vsel %vm457_vm0, %v1749_v3, 0  ;;  %1746 = vset.pattern.permute.xlu0 %v1824_v5  ;;  %v124_v6 = vld [vmem:[%s2417_s2 + $0xf0] sm:$0xff]  ;;  %1747 = vset.pattern.permute.xlu1 %v1824_v5  ;;  %v125_v9 = vld [vmem:[%s2417_s2 + $0xf8] sm:$0xff]  ;;  %v531_v11 = vsel %vm457_vm0, %v1750_v8, 0  ;;  %v122_v12 = vld [vmem:[%s2417_s2 + $0xe0] sm:$0xff] }
   0x3   :  { %1583 = vmatpush3.bf16.xpose.msra.mxu0 %v537_v2  ;;  %284 = vperm.xlu0 %1746, %v124_v6   ;;  %v108_v7 = vld [vmem:[%s2417_s2 + $0x70] sm:$0xff]  ;;  %v109_v10 = vld [vmem:[%s2417_s2 + $0x78] sm:$0xff]  ;;  %v123_v13 = vld [vmem:[%s2417_s2 + $0xe8] sm:$0xff] }
   0x4   :  { %1584 = vmatprep.subr.bf16.mxu0 %v1822_v1  ;;  %204 = vperm.xlu1 %1747, %v108_v7   ;;  %v1751_v14 = vld [vmem:[%s2415_s0 + $0x20] sm:$0xff]   ;;  %v107_v16 = vld [vmem:[%s2417_s2 + $0x68] sm:$0xff]  ;;  %v120_v18 = vld [vmem:[%s2417_s2 + $0xd0] sm:$0xff] }
   0x5   :  { %v106_v15 = vld [vmem:[%s2417_s2 + $0x60] sm:$0xff]  ;;  %v528_v17 = vsel %vm457_vm0, %v1751_v14, 0  ;;  %v121_v19 = vld [vmem:[%s2417_s2 + $0xd8] sm:$0xff]  ;;  %v104_v21 = vld [vmem:[%s2417_s2 + $0x50] sm:$0xff] }
   0x6   :  { %v1752_v20 = vld [vmem:[%s2415_s0 + $0x18] sm:$0xff]   ;;  %v118_v23 = vld [vmem:[%s2417_s2 + $0xc0] sm:$0xff]  ;;  %v119_v25 = vld [vmem:[%s2417_s2 + $0xc8] sm:$0xff] }
   0x7   :  { %289 = vperm.xlu0 %1746, %v125_v9   ;;  %v105_v22 = vld [vmem:[%s2417_s2 + $0x58] sm:$0xff]  ;;  %v525_v24 = vsel %vm457_vm0, %v1752_v20, 0  ;;  %v1753_v26 = vld [vmem:[%s2415_s0 + $0x10] sm:$0xff]   ;;  %v102_v27 = vld [vmem:[%s2417_s2 + $0x40] sm:$0xff] }
   0x8   :  { %209 = vperm.xlu1 %1747, %v109_v10   ;;  %v103_v28 = vld [vmem:[%s2417_s2 + $0x48] sm:$0xff]  ;;  %v116_v29 = vld [vmem:[%s2417_s2 + $0xb0] sm:$0xff]  ;;  %v522_v30 = vsel %vm457_vm0, %v1753_v26, 0  ;;  %v117_v31 = vld [vmem:[%s2417_s2 + $0xb8] sm:$0xff] }
   0x9   :  { %v1754_v32 = vld [vmem:[%s2415_s0 + $0x8] sm:$0xff]   ;;  %v100_v33 = vld [vmem:[%s2417_s2 + $0x30] sm:$0xff]  ;;  %v101_v34 = vld [vmem:[%s2417_s2 + $0x38] sm:$0xff] }
   0xb   :  { %1585 = vmatpush3.bf16.xpose.msra.mxu0 %v534_v4  ;;  %274 = vperm.xlu0 %1746, %v122_v12  }
   0xc   :  { %1586 = vmatprep.subr.bf16.mxu0 %v1822_v1  ;;  %279 = vperm.xlu1 %1747, %v123_v13  }
   0xf   :  { %194 = vperm.xlu0 %1746, %v106_v15  }
  0x10   :  { %199 = vperm.xlu1 %1747, %v107_v16  }
  0x13   :  { %1587 = vmatpush3.bf16.xpose.msra.mxu0 %v531_v11  ;;  %264 = vperm.xlu0 %1746, %v120_v18  }
  0x14   :  { %1588 = vmatprep.subr.bf16.mxu0 %v1822_v1  ;;  %269 = vperm.xlu1 %1747, %v121_v19  }
  0x17   :  { %184 = vperm.xlu0 %1746, %v104_v21  }
  0x18   :  { %189 = vperm.xlu1 %1747, %v105_v22  }
  0x1b   :  { %1589 = vmatpush3.bf16.xpose.msra.mxu0 %v528_v17  ;;  %254 = vperm.xlu0 %1746, %v118_v23  }
  0x1c   :  { %1590 = vmatprep.subr.bf16.mxu0 %v1822_v1  ;;  %259 = vperm.xlu1 %1747, %v119_v25  }
  0x1f   :  { %174 = vperm.xlu0 %1746, %v102_v27  }
  0x20   :  { %179 = vperm.xlu1 %1747, %v103_v28  }
  0x23   :  { %1591 = vmatpush3.bf16.xpose.msra.mxu0 %v525_v24  ;;  %244 = vperm.xlu0 %1746, %v116_v29  }
  0x24   :  { %1592 = vmatprep.subr.bf16.mxu0 %v1822_v1  ;;  %249 = vperm.xlu1 %1747, %v117_v31  }
  0x2b   :  { %1593 = vmatpush3.bf16.xpose.msra.mxu0 %v522_v30 }
  0x2c   :  { %1594 = vmatprep.subr.bf16.mxu0 %v1822_v1 }
  0x2d   :  { %16 = vsyncpa [#allocation3], 0  ;;  %164 = vperm.xlu0 %1746, %v100_v33   ;;  %v519_v35 = vsel %vm457_vm0, %v1754_v32, 0  ;;  %169 = vperm.xlu1 %1747, %v101_v34   ;;  %v114_v36 = vld [vmem:[%s2417_s2 + $0xa0] sm:$0xff]  ;;  %v115_v37 = vld [vmem:[%s2417_s2 + $0xa8] sm:$0xff]  ;;  %vm952_vm2 = vcmask 1045504  }
  0x2e   :  { %v1755_v38 = vld [vmem:[%s2415_s0] sm:$0xff]   ;;  %v99_v40 = vld [vmem:[%s2417_s2 + $0x28] sm:$0xff]  ;;  %v112_v42 = vld [vmem:[%s2417_s2 + $0x90] sm:$0xff]  ;;  %vm936_vm3 = vcmask 359424   ;;  %vm1175_vm4 = vcmask 1044480   ;;  %vm1165_vm5 = vcmask 613376  }
  0x2f   :  { %v98_v39 = vld [vmem:[%s2417_s2 + $0x20] sm:$0xff]  ;;  %v516_v41 = vsel %vm457_vm0, %v1755_v38, 0  ;;  %v113_v43 = vld [vmem:[%s2417_s2 + $0x98] sm:$0xff]  ;;  %v96_v44 = vld [vmem:[%s2417_s2 + $0x10] sm:$0xff]  ;;  %vm1274_vm6 = vcmask 310272   ;;  %vm1281_vm7 = vcmask 1042432  }
  0x30   :  { %v97_v45 = vld [vmem:[%s2417_s2 + $0x18] sm:$0xff]  ;;  %v1756_v46 = vld [vmem:[%s2416_s1] sm:$0xff]   ;;  %v111_v48 = vld [vmem:[%s2417_s2 + $0x88] sm:$0xff]  ;;  %vm1349_vm8 = vcmask 1040384   ;;  %vm1345_vm9 = vcmask 146432   ;;  %s1826_s27 = smov [#allocation2]  }
  0x31   :  { %234 = vperm.xlu0 %1746, %v114_v36   ;;  %239 = vperm.xlu1 %1747, %v115_v37   ;;  %v110_v47 = vld [vmem:[%s2417_s2 + $0x80] sm:$0xff]  ;;  %v95_v50 = vld [vmem:[%s2417_s2 + $0x8] sm:$0xff]  ;;  %v128_v54 = vld [vmem:[%s2417_s2 + $0x110] sm:$0xff]  ;;  %s1400_s0 = sshll.u32 %s1826_s27, 4  ;;  %s1401_s0 = int_to_ptr.vmem [resolvable:$true] %s1400_s0 }
  0x32   :  { %v94_v49 = vld [vmem:[%s2417_s2] sm:$0xff]  ;;  %v1757_v51 = vld [vmem:[%s2416_s1 + $0x8] sm:$0xff]   ;;  %v129_v55 = vld [vmem:[%s2417_s2 + $0x118] sm:$0xff]  ;;  %s1800_s28 = scalar_lea.vmem %s1401_s0, 128  ;;  %p1805_p1 = scmp.lt.s32.totalorder %s1401_s0, %s1401_s0 }
  0x33   :  { %1595 = vmatpush3.bf16.xpose.msra.mxu0 %v519_v35  ;;  %v130_v52 = vld [vmem:[%s2417_s2 + $0x120] sm:$0xff]  ;;  %v131_v53 = vld [vmem:[%s2417_s2 + $0x128] sm:$0xf]  ;;  %v1758_v56 = vld [vmem:[%s2416_s1 + $0x10] sm:$0xff]   ;;  %p1801_p0 = scmp.ne.s32.totalorder %s1401_s0, %s1800_s28  ;;  %p1806_p2 = scmp.lt.s32.totalorder %s1800_s28, %s1800_s28 }
  0x34   :  { %1596 = vmatprep.subr.bf16.mxu0 %v1822_v1  ;;  %v126_v57 = vld [vmem:[%s2417_s2 + $0x100] sm:$0xff]  ;;  %v127_v58 = vld [vmem:[%s2417_s2 + $0x108] sm:$0xff]  ;;  %v1759_v61 = vld [vmem:[%s2416_s1 + $0x18] sm:$0xff]  }
  0x35   :  { %154 = vperm.xlu0 %1746, %v98_v39   ;;  %159 = vperm.xlu1 %1747, %v99_v40   ;;  %v809_v59 = vld [vmem:[%s2419_s4 + $0x40] sm:$0xff]  ;;  %v810_v60 = vld [vmem:[%s2419_s4 + $0x48] sm:$0x7]  ;;  %v807_v62 = vld [vmem:[%s2419_s4 + $0x30] sm:$0xff]  ;;  %p1807_p3 = por %p1806_p2, %p1805_p1 }
  0x36   :  { %v808_v63 = vld [vmem:[%s2419_s4 + $0x38] sm:$0xff]  ;;  %v805_v0 = vld [vmem:[%s2419_s4 + $0x20] sm:$0xff]  ;;  %v806_v2 = vld [vmem:[%s2419_s4 + $0x28] sm:$0xff] }
  0x37   :  { %v1760_v3 = vld [vmem:[%s2416_s1 + $0x20] sm:$0xff]   ;;  %v803_v4 = vld [vmem:[%s2419_s4 + $0x10] sm:$0xff]  ;;  %v804_v5 = vld [vmem:[%s2419_s4 + $0x18] sm:$0xff]  ;;  %p1808_p4 = pnand %p1807_p3, %p1801_p0 }
  0x38   :  { %v801_v6 = vld [vmem:[%s2419_s4] sm:$0xff]  ;;  %v802_v7 = vld [vmem:[%s2419_s4 + $0x8] sm:$0xff]  ;;  %v1124_v10 = vld [vmem:[%s2421_s6 + $0x10] sm:$0xff] }
  0x39   :  { %224 = vperm.xlu0 %1746, %v112_v42   ;;  %229 = vperm.xlu1 %1747, %v113_v43   ;;  %v1761_v8 = vld [vmem:[%s2416_s1 + $0x28] sm:$0xff]   ;;  %v1126_v9 = vld [vmem:[%s2421_s6 + $0x20] sm:$0x3f]  ;;  %v1125_v11 = vld [vmem:[%s2421_s6 + $0x18] sm:$0xff] }
  0x3a   :  { %v1122_v12 = vld [vmem:[%s2421_s6] sm:$0xff]  ;;  %v1762_v13 = vld [vmem:[%s2416_s1 + $0x30] sm:$0xff]   ;;  %v1123_v14 = vld [vmem:[%s2421_s6 + $0x8] sm:$0xff] }
  0x3b   :  { %1597 = vmatpush3.bf16.xpose.msra.mxu0 %v516_v41  ;;  %v1250_v15 = vld [vmem:[%s2423_s8 + $0x10] sm:$0x3]  ;;  %v1248_v16 = vld [vmem:[%s2423_s8] sm:$0xff]  ;;  %v1249_v17 = vld [vmem:[%s2423_s8 + $0x8] sm:$0xff] }
  0x3c   :  { %v1763_v18 = vld [vmem:[%s2416_s1 + $0x38] sm:$0xff]   ;;  %v1339_v19 = vld [vmem:[%s2425_s10] sm:$0x3f]  ;;  %v1765_v21 = vld [vmem:[%s2416_s1 + $0x48] sm:$0xff]  }
  0x3d   :  { %144 = vperm.xlu0 %1746, %v96_v44   ;;  %149 = vperm.xlu1 %1747, %v97_v45   ;;  %v1764_v20 = vld [vmem:[%s2416_s1 + $0x40] sm:$0xff]   ;;  %v1766_v22 = vld [vmem:[%s2416_s1 + $0x50] sm:$0xff]   ;;  %v1767_v23 = vld [vmem:[%s2416_s1 + $0x58] sm:$0xff]  }
  0x3e   :  { %v1768_v24 = vld [vmem:[%s2416_s1 + $0x60] sm:$0xff]   ;;  %v1769_v25 = vld [vmem:[%s2416_s1 + $0x68] sm:$0xff]   ;;  %v1770_v28 = vld [vmem:[%s2416_s1 + $0x70] sm:$0xff]  }
  0x3f   :  { %v1771_v32 = vld [vmem:[%s2416_s1 + $0x78] sm:$0xff]   ;;  %v1772_v36 = vld [vmem:[%s2416_s1 + $0x80] sm:$0xff]   ;;  %v1773_v39 = vld [vmem:[%s2416_s1 + $0x88] sm:$0xff]  }
  0x40   :  { %v1774_v43 = vld [vmem:[%s2416_s1 + $0x90] sm:$0x3f]  }
  0x41   :  { %214 = vperm.xlu0 %1746, %v110_v47   ;;  %219 = vperm.xlu1 %1747, %v111_v48  }
  0x42   :  { %1599 = vmatmul.mubr.msk.bf16.vlgmr.msra.gmra.mxu0 %vm457_vm0, %v1756_v46 }
  0x43   :  { %1602 = vmatprep.mubr.msk.bf16.mxu0 %vm1823_vm1, %v1822_v1 }
  0x45   :  { %134 = vperm.xlu0 %1746, %v94_v49   ;;  %139 = vperm.xlu1 %1747, %v95_v50  }
  0x49   :  { %314 = vperm.xlu0 %1746, %v130_v52   ;;  %319 = vperm.xlu1 %1747, %v131_v53  }
  0x4a   :  { %1603 = vmatmul.mubr.msk.bf16.gmra.mxu0 %vm457_vm0, %v1757_v51 }
  0x4b   :  { %1606 = vmatprep.mubr.msk.bf16.mxu0 %vm1823_vm1, %v1822_v1 }
  0x4d   :  { %304 = vperm.xlu0 %1746, %v128_v54   ;;  %309 = vperm.xlu1 %1747, %v129_v55  }
  0x51   :  { %294 = vperm.xlu0 %1746, %v126_v57   ;;  %299 = vperm.xlu1 %1747, %v127_v58  }
  0x52   :  { %1607 = vmatmul.mubr.msk.bf16.gmra.mxu0 %vm457_vm0, %v1758_v56 }
  0x53   :  { %1610 = vmatprep.mubr.msk.bf16.mxu0 %vm1823_vm1, %v1822_v1 }
  0x55   :  { %853 = vperm.xlu0 %1746, %v809_v59   ;;  %858 = vperm.xlu1 %1747, %v810_v60  }
  0x59   :  { %843 = vperm.xlu0 %1746, %v807_v62   ;;  %848 = vperm.xlu1 %1747, %v808_v63  }
  0x5a   :  { %1611 = vmatmul.mubr.msk.bf16.gmra.mxu0 %vm457_vm0, %v1759_v61 }
  0x5b   :  { %1614 = vmatprep.mubr.msk.bf16.mxu0 %vm1823_vm1, %v1822_v1 }
  0x5d   :  { %833 = vperm.xlu0 %1746, %v805_v0   ;;  %838 = vperm.xlu1 %1747, %v806_v2  }
  0x61   :  { %823 = vperm.xlu0 %1746, %v803_v4   ;;  %828 = vperm.xlu1 %1747, %v804_v5  }
  0x62   :  { %1615 = vmatmul.mubr.msk.bf16.gmra.mxu0 %vm457_vm0, %v1760_v3 }
  0x63   :  { %1618 = vmatprep.mubr.msk.bf16.mxu0 %vm1823_vm1, %v1822_v1 }
  0x65   :  { %813 = vperm.xlu0 %1746, %v801_v6   ;;  %818 = vperm.xlu1 %1747, %v802_v7  }
  0x69   :  { %1149 = vperm.xlu0 %1746, %v1126_v9   ;;  %1139 = vperm.xlu1 %1747, %v1124_v10  }
  0x6a   :  { %1619 = vmatmul.mubr.msk.bf16.gmra.mxu0 %vm457_vm0, %v1761_v8 }
  0x6b   :  { %1622 = vmatprep.mubr.msk.bf16.mxu0 %vm1823_vm1, %v1822_v1 }
  0x6d   :  { %1144 = vperm.xlu0 %1746, %v1125_v11   ;;  %1129 = vperm.xlu1 %1747, %v1122_v12  }
  0x71   :  { %1134 = vperm.xlu0 %1746, %v1123_v14   ;;  %1263 = vperm.xlu1 %1747, %v1250_v15  }
  0x72   :  { %1623 = vmatmul.mubr.msk.bf16.gmra.mxu0 %vm457_vm0, %v1762_v13 }
  0x73   :  { %1626 = vmatprep.mubr.msk.bf16.mxu0 %vm1823_vm1, %v1822_v1 }
  0x75   :  { %1253 = vperm.xlu0 %1746, %v1248_v16   ;;  %1258 = vperm.xlu1 %1747, %v1249_v17  }
  0x79   :  { %1342 = vperm.xlu0 %1746, %v1339_v19  }
  0x7a   :  { %1627 = vmatmul.mubr.msk.bf16.gmra.mxu0 %vm457_vm0, %v1763_v18 }
  0x7b   :  { %1630 = vmatprep.mubr.msk.bf16.mxu0 %vm1823_vm1, %v1822_v1 }
  0x7e   :  { %v2181_v26 = vpop.permute.xlu0 %284 }
  0x7f   :  { %v2184_v27 = vpop.permute.xlu1 %204 }
  0x82   :  { %1631 = vmatmul.mubr.msk.bf16.gmra.mxu0 %vm457_vm0, %v1764_v20  ;;  %v2191_v29 = vpop.permute.xlu0 %289 }
  0x83   :  { %1634 = vmatprep.mubr.msk.bf16.mxu0 %vm1823_vm1, %v1822_v1  ;;  %v2193_v30 = vpop.permute.xlu1 %209 }
  0x86   :  { %v2198_v31 = vpop.permute.xlu0 %274 }
  0x87   :  { %v2203_v33 = vpop.permute.xlu1 %279 }
  0x8a   :  { %1635 = vmatmul.mubr.msk.bf16.gmra.mxu0 %vm457_vm0, %v1765_v21  ;;  %v2206_v34 = vpop.permute.xlu0 %194 }
  0x8b   :  { %1638 = vmatprep.mubr.msk.bf16.mxu0 %vm1823_vm1, %v1822_v1  ;;  %v2210_v35 = vpop.permute.xlu1 %199 }
  0x8e   :  { %v2215_v37 = vpop.permute.xlu0 %264 }
  0x8f   :  { %v2218_v38 = vpop.permute.xlu1 %269 }
  0x92   :  { %1639 = vmatmul.mubr.msk.bf16.gmra.mxu0 %vm457_vm0, %v1766_v22  ;;  %v2225_v40 = vpop.permute.xlu0 %184 }
  0x93   :  { %1642 = vmatprep.mubr.msk.bf16.mxu0 %vm1823_vm1, %v1822_v1  ;;  %v2227_v41 = vpop.permute.xlu1 %189 }
  0x96   :  { %v2232_v42 = vpop.permute.xlu0 %254 }
  0x97   :  { %v2237_v44 = vpop.permute.xlu1 %259 }
  0x9a   :  { %1643 = vmatmul.mubr.msk.bf16.gmra.mxu0 %vm457_vm0, %v1767_v23  ;;  %v175_v45 = vpop.permute.xlu0 %174 }
  0x9b   :  { %1646 = vmatprep.mubr.msk.bf16.mxu0 %vm1823_vm1, %v1822_v1  ;;  %v180_v46 = vpop.permute.xlu1 %179 }
  0x9e   :  { %v2240_v47 = vpop.permute.xlu0 %244 }
  0x9f   :  { %v2242_v48 = vpop.permute.xlu1 %249 }
  0xa2   :  { %1647 = vmatmul.mubr.msk.bf16.gmra.mxu0 %vm457_vm0, %v1768_v24 }
  0xa3   :  { %1650 = vmatprep.mubr.msk.bf16.mxu0 %vm1823_vm1, %v1822_v1 }
  0xa8   :  { %v165_v49 = vpop.permute.xlu0 %164  ;;  %v170_v50 = vpop.permute.xlu1 %169 }
  0xaa   :  { %1651 = vmatmul.mubr.msk.bf16.gmra.mxu0 %vm457_vm0, %v1769_v25 }
  0xab   :  { %1654 = vmatprep.mubr.msk.bf16.mxu0 %vm1823_vm1, %v1822_v1 }
  0xac   :  { %v2244_v51 = vpop.permute.xlu0 %234  ;;  %v2246_v52 = vpop.permute.xlu1 %239 }
  0xb0   :  { %v155_v53 = vpop.permute.xlu0 %154  ;;  %v160_v54 = vpop.permute.xlu1 %159 }
  0xb2   :  { %1655 = vmatmul.mubr.msk.bf16.gmra.mxu0 %vm457_vm0, %v1770_v28 }
  0xb3   :  { %1658 = vmatprep.mubr.msk.bf16.mxu0 %vm1823_vm1, %v1822_v1 }
  0xb4   :  { %v2248_v55 = vpop.permute.xlu0 %224  ;;  %v2250_v56 = vpop.permute.xlu1 %229 }
  0xb8   :  { %v145_v57 = vpop.permute.xlu0 %144  ;;  %v150_v58 = vpop.permute.xlu1 %149 }
  0xba   :  { %1659 = vmatmul.mubr.msk.bf16.gmra.mxu0 %vm457_vm0, %v1771_v32 }
  0xbb   :  { %1662 = vmatprep.mubr.msk.bf16.mxu0 %vm1823_vm1, %v1822_v1 }
  0xbc   :  { %v2252_v59 = vpop.permute.xlu0 %214  ;;  %v2254_v60 = vpop.permute.xlu1 %219 }
  0xc0   :  { %v135_v61 = vpop.permute.xlu0 %134  ;;  %v140_v0 = vpop.permute.xlu1 %139 }
  0xc2   :  { %1663 = vmatmul.mubr.msk.bf16.gmra.mxu0 %vm457_vm0, %v1772_v36 }
  0xc3   :  { %1666 = vmatprep.mubr.msk.bf16.mxu0 %vm1823_vm1, %v1822_v1 }
  0xca   :  { %1667 = vmatmul.mubr.msk.bf16.gmra.mxu0 %vm457_vm0, %v1773_v39 }
  0xcb   :  { %1670 = vmatprep.mubr.msk.bf16.mxu0 %vm1823_vm1, %v1822_v1 }
  0xd2   :  { %1671 = vmatmul.mubr.msk.bf16.gmra.mxu0 %vm457_vm0, %v1774_v43 }
 0x102   :  { %v573_v62 = vpop.f32.mrf.mxu0 }
 0x103   :  { %v574_v2 = vadd.f32 %v573_v62, %v135_v61 }
 0x104   :  { %v1600_v63 = vpop.f32.mrf.mxu0 }
 0x105   :  { %v724_v6 = vmax.f32 %v574_v2, 0.0 }
 0x106   :  { %v576_v3 = vpop.f32.mrf.mxu0 }
 0x107   :  { %v577_v4 = vadd.f32 %v576_v3, %v140_v0 }
 0x108   :  { %v1601_v5 = vpop.f32.mrf.mxu0 }
 0x109   :  { %v725_v7 = vmax.f32 %v577_v4, 0.0 }
 0x10a   :  { %v581_v8 = vpop.f32.mrf.mxu0 }
 0x10b   :  { %v2256_v9 = vpack.c.bf16 %v725_v7, %v724_v6  ;;  %v582_v11 = vadd.f32 %v581_v8, %v145_v57 }
 0x10c   :  { %v1604_v10 = vpop.f32.mrf.mxu0 }
 0x10d   :  { %v726_v15 = vmax.f32 %v582_v11, 0.0 }
 0x10e   :  { %v584_v12 = vpop.f32.mrf.mxu0 }
 0x10f   :  { %v585_v13 = vadd.f32 %v584_v12, %v150_v58 }
 0x110   :  { %v1605_v14 = vpop.f32.mrf.mxu0 }
 0x111   :  { %v727_v16 = vmax.f32 %v585_v13, 0.0 }
 0x112   :  { %v589_v17 = vpop.f32.mrf.mxu0 }
 0x113   :  { %v2258_v18 = vpack.c.bf16 %v727_v16, %v726_v15  ;;  %v590_v20 = vadd.f32 %v589_v17, %v155_v53  ;;  %v1777_v53 = vld [vmem:[%s2418_s3 + $0x4] ss:$12 sps:$4 sm:$0xff]  }
 0x114   :  { %v1608_v19 = vpop.f32.mrf.mxu0  ;;  %988 = vmatprep.mubr.bf16.mxu1 %v1777_v53 }
 0x115   :  { %v728_v24 = vmax.f32 %v590_v20, 0.0 }
 0x116   :  { %v592_v21 = vpop.f32.mrf.mxu0 }
 0x117   :  { %v593_v22 = vadd.f32 %v592_v21, %v160_v54 }
 0x118   :  { %v1609_v23 = vpop.f32.mrf.mxu0 }
 0x119   :  { %v729_v25 = vmax.f32 %v593_v22, 0.0 }
 0x11a   :  { %v597_v28 = vpop.f32.mrf.mxu0 }
 0x11b   :  { %v2260_v32 = vpack.c.bf16 %v729_v25, %v728_v24  ;;  %v598_v39 = vadd.f32 %v597_v28, %v165_v49 }
 0x11c   :  { %v1612_v36 = vpop.f32.mrf.mxu0 }
 0x11d   :  { %v730_v61 = vmax.f32 %v598_v39, 0.0 }
 0x11e   :  { %v600_v43 = vpop.f32.mrf.mxu0 }
 0x11f   :  { %v601_v57 = vadd.f32 %v600_v43, %v170_v50 }
 0x120   :  { %v1613_v58 = vpop.f32.mrf.mxu0 }
 0x121   :  { %v731_v62 = vmax.f32 %v601_v57, 0.0 }
 0x122   :  { %v605_v63 = vpop.f32.mrf.mxu0 }
 0x123   :  { %v2265_v0 = vpack.c.bf16 %v731_v62, %v730_v61  ;;  %v606_v2 = vadd.f32 %v605_v63, %v175_v45 }
 0x124   :  { %v1616_v54 = vpop.f32.mrf.mxu0 }
 0x125   :  { %v732_v6 = vmax.f32 %v606_v2, 0.0 }
 0x126   :  { %v608_v3 = vpop.f32.mrf.mxu0 }
 0x127   :  { %v609_v4 = vadd.f32 %v608_v3, %v180_v46 }
 0x128   :  { %v1617_v5 = vpop.f32.mrf.mxu0 }
 0x129   :  { %v733_v49 = vmax.f32 %v609_v4, 0.0 }
 0x12a   :  { %v613_v7 = vpop.f32.mrf.mxu0 }
 0x12b   :  { %v2267_v50 = vpack.c.bf16 %v733_v49, %v732_v6  ;;  %v614_v10 = vadd.f32 %v613_v7, %v2225_v40 }
 0x12c   :  { %v1620_v8 = vpop.f32.mrf.mxu0 }
 0x12d   :  { %v734_v14 = vmax.f32 %v614_v10, 0.0 }
 0x12e   :  { %v616_v11 = vpop.f32.mrf.mxu0 }
 0x12f   :  { %v617_v12 = vadd.f32 %v616_v11, %v2227_v41 }
 0x130   :  { %v1621_v13 = vpop.f32.mrf.mxu0 }
 0x131   :  { %v735_v15 = vmax.f32 %v617_v12, 0.0 }
 0x132   :  { %v621_v16 = vpop.f32.mrf.mxu0 }
 0x133   :  { %v2271_v17 = vpack.c.bf16 %v735_v15, %v734_v14  ;;  %v622_v46 = vadd.f32 %v621_v16, %v2206_v34 }
 0x134   :  { %v1624_v45 = vpop.f32.mrf.mxu0 }
 0x135   :  { %v736_v22 = vmax.f32 %v622_v46, 0.0 }
 0x136   :  { %v624_v19 = vpop.f32.mrf.mxu0 }
 0x137   :  { %v625_v20 = vadd.f32 %v624_v19, %v2210_v35 }
 0x138   :  { %v1625_v21 = vpop.f32.mrf.mxu0 }
 0x139   :  { %v737_v23 = vmax.f32 %v625_v20, 0.0 }
 0x13a   :  { %v629_v24 = vpop.f32.mrf.mxu0 }
 0x13b   :  { %v2275_v40 = vpack.c.bf16 %v737_v23, %v736_v22  ;;  %v630_v41 = vadd.f32 %v629_v24, %v2184_v27 }
 0x13c   :  { %v1628_v25 = vpop.f32.mrf.mxu0 }
 0x13d   :  { %v738_v43 = vmax.f32 %v630_v41, 0.0 }
 0x13e   :  { %v632_v28 = vpop.f32.mrf.mxu0 }
 0x13f   :  { %v633_v36 = vadd.f32 %v632_v28, %v2193_v30 }
 0x140   :  { %v1629_v39 = vpop.f32.mrf.mxu0 }
 0x141   :  { %v739_v57 = vmax.f32 %v633_v36, 0.0 }
 0x142   :  { %v637_v58 = vpop.f32.mrf.mxu0 }
 0x143   :  { %v769_v34 = vpack.c.bf16 %v739_v57, %v738_v43  ;;  %v638_v35 = vadd.f32 %v637_v58, %v2252_v59 }
 0x144   :  { %v1632_v61 = vpop.f32.mrf.mxu0 }
 0x145   :  { %v740_v54 = vmax.f32 %v638_v35, 0.0 }
 0x146   :  { %v640_v62 = vpop.f32.mrf.mxu0 }
 0x147   :  { %v641_v63 = vadd.f32 %v640_v62, %v2254_v60 }
 0x148   :  { %v1633_v53 = vpop.f32.mrf.mxu0 }
 0x149   :  { %v741_v2 = vmax.f32 %v641_v63, 0.0 }
 0x14a   :  { %v645_v3 = vpop.f32.mrf.mxu0 }
 0x14b   :  { %v2281_v4 = vpack.c.bf16 %v741_v2, %v740_v54  ;;  %v646_v30 = vadd.f32 %v645_v3, %v2248_v55 }
 0x14c   :  { %v1636_v27 = vpop.f32.mrf.mxu0 }
 0x14d   :  { %v742_v7 = vmax.f32 %v646_v30, 0.0 }
 0x14e   :  { %v648_v5 = vpop.f32.mrf.mxu0 }
 0x14f   :  { %v649_v6 = vadd.f32 %v648_v5, %v2250_v56 }
 0x150   :  { %v1637_v49 = vpop.f32.mrf.mxu0 }
 0x151   :  { %v743_v8 = vmax.f32 %v649_v6, 0.0 }
 0x152   :  { %v653_v10 = vpop.f32.mrf.mxu0 }
 0x153   :  { %v2285_v59 = vpack.c.bf16 %v743_v8, %v742_v7 }
 0x154   :  { %v1640_v11 = vpop.f32.mrf.mxu0 }
 0x156   :  { %v656_v60 = vpop.f32.mrf.mxu0 }
 0x158   :  { %v1641_v12 = vpop.f32.mrf.mxu0 }
 0x15a   :  { %v661_v13 = vpop.f32.mrf.mxu0 }
 0x15b   :  { %v662_v12 = vadd.f32 %v661_v13, %v2240_v47 }
 0x15c   :  { %v1644_v14 = vpop.f32.mrf.mxu0 }
 0x15e   :  { %v664_v15 = vpop.f32.mrf.mxu0 }
 0x15f   :  { %v665_v7 = vadd.f32 %v664_v15, %v2242_v48  ;;  %v746_v48 = vmax.f32 %v662_v12, 0.0 }
 0x160   :  { %v1645_v16 = vpop.f32.mrf.mxu0 }
 0x161   :  { %v657_v16 = vadd.f32 %v656_v60, %v2246_v52  ;;  %v320_v60 = vpop.permute.xlu1 %319 }
 0x162   :  { %v669_v45 = vpop.f32.mrf.mxu0 }
 0x164   :  { %v1648_v46 = vpop.f32.mrf.mxu0 }
 0x166   :  { %v672_v19 = vpop.f32.mrf.mxu0 }
 0x168   :  { %v1649_v55 = vpop.f32.mrf.mxu0 }
 0x16a   :  { %v677_v20 = vpop.f32.mrf.mxu0 }
 0x16b   :  { %v678_v3 = vadd.f32 %v677_v20, %v2215_v37 }
 0x16c   :  { %v1652_v21 = vpop.f32.mrf.mxu0 }
 0x16d   :  { %v315_v21 = vpop.permute.xlu0 %314 }
 0x16e   :  { %v680_v56 = vpop.f32.mrf.mxu0 }
 0x16f   :  { %v681_v62 = vadd.f32 %v680_v56, %v2218_v38  ;;  %v750_v38 = vmax.f32 %v678_v3, 0.0  ;;  %v310_v56 = vpop.permute.xlu1 %309  ;;  %v1789_v3 = vld [vmem:[%s2418_s3 + $0x60] ss:$12 sps:$4 sm:$0x3f]  }
 0x170   :  { %v1653_v22 = vpop.f32.mrf.mxu0 }
 0x171   :  { %v751_v5 = vmax.f32 %v681_v62, 0.0 }
 0x172   :  { %v685_v23 = vpop.f32.mrf.mxu0 }
 0x173   :  { %v686_v58 = vadd.f32 %v685_v23, %v2198_v31  ;;  %v775_v11 = vpack.c.bf16 %v751_v5, %v750_v38  ;;  %v1794_v5 = vld [vmem:[%s2418_s3 + $0x68] ss:$12 sps:$4 sm:$0x3f]  }
 0x174   :  { %v1656_v24 = vpop.f32.mrf.mxu0 }
 0x175   :  { %v752_v27 = vmax.f32 %v686_v58, 0.0  ;;  %v1780_v58 = vld [vmem:[%s2418_s3 + $0x18] ss:$12 sps:$4 sm:$0xff]  }
 0x176   :  { %v688_v25 = vpop.f32.mrf.mxu0 }
 0x177   :  { %v689_v39 = vadd.f32 %v688_v25, %v2203_v33  ;;  %v1775_v25 = vld [vmem:[%s2418_s3] ss:$12 sps:$4 sm:$0xff]  }
 0x178   :  { %v1657_v41 = vpop.f32.mrf.mxu0 }
 0x179   :  { %v753_v63 = vmax.f32 %v689_v39, 0.0 }
 0x17a   :  { %v693_v28 = vpop.f32.mrf.mxu0 }
 0x17b   :  { %v694_v43 = vadd.f32 %v693_v28, %v2181_v26  ;;  %v673_v26 = vadd.f32 %v672_v19, %v2237_v44  ;;  %v776_v6 = vpack.c.bf16 %v753_v63, %v752_v27  ;;  %v745_v19 = vmax.f32 %v657_v16, 0.0  ;;  %v1783_v63 = vld [vmem:[%s2418_s3 + $0x30] ss:$12 sps:$4 sm:$0xff]   ;;  %v1790_v27 = vld [vmem:[%s2418_s3 + $0x8] ss:$12 sps:$4 sm:$0xff]  }
 0x17c   :  { %v1660_v36 = vpop.f32.mrf.mxu0 }
 0x17d   :  { %v754_v53 = vmax.f32 %v694_v43, 0.0  ;;  %v749_v8 = vmax.f32 %v673_v26, 0.0  ;;  %v1793_v26 = vld [vmem:[%s2418_s3 + $0x50] ss:$12 sps:$4 sm:$0xff]  }
 0x17e   :  { %v696_v57 = vpop.f32.mrf.mxu0 }
 0x17f   :  { %v697_v61 = vadd.f32 %v696_v57, %v2191_v29  ;;  %v670_v29 = vadd.f32 %v669_v45, %v2232_v42  ;;  %v654_v45 = vadd.f32 %v653_v10, %v2244_v51 }
 0x180   :  { %v1661_v35 = vpop.f32.mrf.mxu0 }
 0x181   :  { %v755_v54 = vmax.f32 %v697_v61, 0.0  ;;  %v748_v44 = vmax.f32 %v670_v29, 0.0  ;;  %v744_v47 = vmax.f32 %v654_v45, 0.0  ;;  %v1781_v35 = vld [vmem:[%s2418_s3 + $0x34] ss:$12 sps:$4 sm:$0xff]  }
 0x182   :  { %v2292_v2 = vpop.f32.mrf.mxu0 }
 0x183   :  { %v777_v30 = vpack.c.bf16 %v755_v54, %v754_v53  ;;  %v774_v46 = vpack.c.bf16 %v749_v8, %v748_v44  ;;  %v772_v20 = vpack.c.bf16 %v745_v19, %v744_v47  ;;  %v1784_v53 = vld [vmem:[%s2418_s3 + $0x4c] ss:$12 sps:$4 sm:$0xff]   ;;  %v1786_v54 = vld [vmem:[%s2418_s3 + $0x48] ss:$12 sps:$4 sm:$0xff]  }
 0x184   :  { %v1664_v33 = vpop.f32.mrf.mxu0 }
 0x185   :  { %1512 = vmatprep.subr.bf16.mxu1 %v777_v30  ;;  %v1791_v30 = vld [vmem:[%s2418_s3 + $0x20] ss:$12 sps:$4 sm:$0xff]   ;;  %v1792_v33 = vld [vmem:[%s2418_s3 + $0x38] ss:$12 sps:$4 sm:$0xff]  }
 0x186   :  { %v704_v31 = vpop.f32.mrf.mxu0  ;;  %1513 = vmatpush3.bf16.msra.mxu1 %v769_v34  ;;  %v747_v34 = vmax.f32 %v665_v7, 0.0 }
 0x187   :  { %1514 = vmatprep.subr.bf16.mxu1 %v776_v6 }
 0x188   :  { %v1665_v49 = vpop.f32.mrf.mxu0  ;;  %v773_v55 = vpack.c.bf16 %v747_v34, %v746_v48 }
 0x18a   :  { %v709_v37 = vpop.f32.mrf.mxu0  ;;  %1515 = vmatpush3.bf16.msra.mxu1 %v2275_v40 }
 0x18b   :  { %1516 = vmatprep.subr.bf16.mxu1 %v775_v11 }
 0x18c   :  { %v1668_v14 = vpop.f32.mrf.mxu0 }
 0x18e   :  { %v712_v42 = vpop.f32.mrf.mxu0  ;;  %1517 = vmatpush3.bf16.msra.mxu1 %v2271_v17 }
 0x18f   :  { %1518 = vmatprep.subr.bf16.mxu1 %v774_v46  ;;  %v713_v24 = vadd.f32 %v712_v42, %v310_v56 }
 0x190   :  { %v1669_v15 = vpop.f32.mrf.mxu0 }
 0x191   :  { %v759_v28 = vmax.f32 %v713_v24, 0.0 }
 0x192   :  { %v717_v40 = vpop.f32.mrf.mxu0  ;;  %1519 = vmatpush3.bf16.msra.mxu1 %v2267_v50  ;;  %v305_v50 = vpop.permute.xlu0 %304 }
 0x193   :  { %1520 = vmatprep.subr.bf16.mxu1 %v773_v55  ;;  %v718_v10 = vadd.f32 %v717_v40, %v315_v21  ;;  %v710_v41 = vadd.f32 %v709_v37, %v305_v50 }
 0x194   :  { %v1672_v13 = vpop.f32.mrf.mxu0 }
 0x195   :  { %v760_v23 = vmax.f32 %v718_v10, 0.0  ;;  %v758_v43 = vmax.f32 %v710_v41, 0.0 }
 0x196   :  { %v720_v52 = vpop.f32.mrf.mxu0  ;;  %1521 = vmatpush3.bf16.msra.mxu1 %v2265_v0 }
 0x197   :  { %1522 = vmatprep.subr.bf16.mxu1 %v772_v20  ;;  %v721_v51 = vadd.f32 %v720_v52, %v320_v60  ;;  %v779_v57 = vpack.c.bf16 %v759_v28, %v758_v43 }
 0x198   :  { %v1673_v17 = vpop.f32.mrf.mxu0 }
 0x199   :  { %v761_v22 = vmax.f32 %v721_v51, 0.0 }
 0x19a   :  { %1523 = vmatpush3.bf16.msra.mxu1 %v2260_v32  ;;  %v1778_v32 = vld [vmem:[%s2418_s3 + $0x1c] ss:$12 sps:$4 sm:$0xff]  }
 0x19b   :  { %1524 = vmatprep.subr.bf16.mxu1 %v2285_v59  ;;  %v780_v0 = vpack.c.bf16 %v761_v22, %v760_v23  ;;  %v300_v59 = vpop.permute.xlu1 %299 }
 0x19d   :  { %v954_v36 = vsel %vm952_vm2, %v780_v0, 0 }
 0x19e   :  { %1525 = vmatpush3.bf16.msra.mxu1 %v2258_v18  ;;  %v705_v18 = vadd.f32 %v704_v31, %v300_v59 }
 0x19f   :  { %1526 = vmatprep.subr.bf16.mxu1 %v2281_v4  ;;  %v295_v4 = vpop.permute.xlu0 %294  ;;  %v859_v46 = vpop.permute.xlu1 %858 }
 0x1a0   :  { %v702_v39 = vadd.f32 %v2292_v2, %v295_v4  ;;  %v1787_v2 = vld [vmem:[%s2418_s3 + $0x64] ss:$12 sps:$4 sm:$0x3f]  }
 0x1a2   :  { %1527 = vmatpush3.bf16.msra.mxu1 %v2256_v9  ;;  %v757_v9 = vmax.f32 %v705_v18, 0.0  ;;  %v756_v61 = vmax.f32 %v702_v39, 0.0 }
 0x1a3   :  { %1674 = vmatprep.subr.bf16.mxu1 %v1822_v1  ;;  %v854_v16 = vpop.permute.xlu0 %853  ;;  %v849_v55 = vpop.permute.xlu1 %848 }
 0x1a4   :  { %v778_v62 = vpack.c.bf16 %v757_v9, %v756_v61 }
 0x1a5   :  { %989 = vmatmul.mubr.bf16.vlgmr.msra.gmra.mxu1 %v1775_v25 }
 0x1a6   :  { %1675 = vmatpush3.bf16.msra.mxu1 %v954_v36  ;;  %996 = vmatprep.mubr.bf16.mxu1 %v1778_v32 }
 0x1a7   :  { %1676 = vmatprep.subr.bf16.mxu1 %v1822_v1  ;;  %v2372_v15 = vpop.permute.xlu0 %843  ;;  %v839_v52 = vpop.permute.xlu1 %838 }
 0x1aa   :  { %1677 = vmatpush3.bf16.msra.mxu1 %v779_v57 }
 0x1ab   :  { %1678 = vmatprep.subr.bf16.mxu1 %v1822_v1  ;;  %v2374_v13 = vpop.permute.xlu0 %833  ;;  %v829_v10 = vpop.permute.xlu1 %828 }
 0x1ad   :  { %997 = vmatmul.mubr.bf16.gmra.mxu1 %v1780_v58 }
 0x1ae   :  { %1679 = vmatpush3.bf16.msra.mxu1 %v778_v62  ;;  %1004 = vmatprep.mubr.bf16.mxu1 %v1781_v35 }
 0x1af   :  { %1700 = vmatprep.subr.bf16.mxu1 %v1822_v1  ;;  %v824_v21 = vpop.permute.xlu0 %823  ;;  %v819_v0 = vpop.permute.xlu1 %818 }
 0x1b3   :  { %v814_v50 = vpop.permute.xlu0 %813 }
 0x1b5   :  { %1005 = vmatmul.mubr.bf16.gmra.mxu1 %v1783_v63 }
 0x1b6   :  { %1012 = vmatprep.mubr.bf16.mxu1 %v1784_v53 }
 0x1bd   :  { %1013 = vmatmul.mubr.bf16.gmra.mxu1 %v1786_v54 }
 0x1be   :  { %1020 = vmatprep.mubr.bf16.mxu1 %v1787_v2 }
 0x1c5   :  { %1021 = vmatmul.mubr.bf16.gmra.mxu1 %v1789_v3 }
 0x1c6   :  { %1680 = vmatprep.mubr.msk.bf16.mxu1 %vm1823_vm1, %v1822_v1 }
 0x1cd   :  { %1681 = vmatmul.mubr.msk.bf16.vlgmr.msra.gmra.mxu1 %vm936_vm3, %v1790_v27 }
 0x1ce   :  { %1684 = vmatprep.mubr.msk.bf16.mxu1 %vm1823_vm1, %v1822_v1 }
 0x1d5   :  { %1685 = vmatmul.mubr.msk.bf16.gmra.mxu1 %vm936_vm3, %v1791_v30 }
 0x1d6   :  { %1688 = vmatprep.mubr.msk.bf16.mxu1 %vm1823_vm1, %v1822_v1 }
 0x1dd   :  { %1689 = vmatmul.mubr.msk.bf16.gmra.mxu1 %vm936_vm3, %v1792_v33 }
 0x1de   :  { %1692 = vmatprep.mubr.msk.bf16.mxu1 %vm1823_vm1, %v1822_v1 }
 0x1e5   :  { %1693 = vmatmul.mubr.msk.bf16.gmra.mxu1 %vm936_vm3, %v1793_v26 }
 0x1e6   :  { %1696 = vmatprep.mubr.msk.bf16.mxu1 %vm1823_vm1, %v1822_v1 }
 0x1ed   :  { %1697 = vmatmul.mubr.msk.bf16.gmra.mxu1 %vm936_vm3, %v1794_v5 }
 0x1ee   :  { %1710 = vmatprep.mubr.msk.bf16.mxu1 %vm1823_vm1, %v1822_v1 }
 0x265   :  { %v1528_v6 = vpop.f32.mrf.mxu1 }
 0x267   :  { %v1529_v31 = vpop.f32.mrf.mxu1 }
 0x268   :  { %v1530_v29 = vadd.f32 %v1529_v31, %v1528_v6 }
 0x269   :  { %v1531_v38 = vpop.f32.mrf.mxu1 }
 0x26a   :  { %v991_v24 = vadd.f32 %v1530_v29, %v814_v50 }
 0x26b   :  { %v1532_v49 = vpop.f32.mrf.mxu1 }
 0x26c   :  { %v1533_v7 = vadd.f32 %v1532_v49, %v1531_v38 }
 0x26d   :  { %v1534_v8 = vpop.f32.mrf.mxu1 }
 0x26e   :  { %v994_v32 = vadd.f32 %v1533_v7, %v819_v0 }
 0x26f   :  { %v1535_v11 = vpop.f32.mrf.mxu1 }
 0x270   :  { %v1536_v37 = vadd.f32 %v1535_v11, %v1534_v8 }
 0x271   :  { %v1537_v12 = vpop.f32.mrf.mxu1 }
 0x272   :  { %v999_v9 = vadd.f32 %v1536_v37, %v824_v21 }
 0x273   :  { %v1538_v44 = vpop.f32.mrf.mxu1 }
 0x274   :  { %v1539_v14 = vadd.f32 %v1538_v44, %v1537_v12 }
 0x275   :  { %v1540_v34 = vpop.f32.mrf.mxu1 }
 0x276   :  { %v1002_v61 = vadd.f32 %v1539_v14, %v829_v10 }
 0x277   :  { %v1541_v42 = vpop.f32.mrf.mxu1 }
 0x278   :  { %v2370_v45 = vadd.f32 %v1541_v42, %v1540_v34  ;;  %v1825_v34 = vmov 65535  }
 0x279   :  { %v1543_v48 = vpop.f32.mrf.mxu1  ;;  %v1176_v42 = vsel %vm1175_vm4, 4294967295, %v1825_v34 }
 0x27b   :  { %v1544_v19 = vpop.f32.mrf.mxu1 }
 0x27c   :  { %v1545_v21 = vadd.f32 %v1544_v19, %v1543_v48 }
 0x27d   :  { %v1546_v40 = vpop.f32.mrf.mxu1 }
 0x27f   :  { %v1547_v47 = vpop.f32.mrf.mxu1 }
 0x280   :  { %v1548_v37 = vadd.f32 %v1547_v47, %v1546_v40 }
 0x281   :  { %v1549_v20 = vpop.f32.mrf.mxu1 }
 0x283   :  { %v1550_v60 = vpop.f32.mrf.mxu1 }
 0x284   :  { %v1551_v7 = vadd.f32 %v1550_v60, %v1549_v20  ;;  %v1177_v20 = vsel %vm952_vm2, %v1176_v42, 0 }
 0x285   :  { %v1552_v17 = vpop.f32.mrf.mxu1 }
 0x286   :  { %v1018_v10 = vadd.f32 %v1551_v7, %v849_v55 }
 0x287   :  { %v1553_v51 = vpop.f32.mrf.mxu1 }
 0x288   :  { %v1554_v31 = vadd.f32 %v1553_v51, %v1552_v17 }
 0x289   :  { %v1555_v56 = vpop.f32.mrf.mxu1 }
 0x28a   :  { %v1023_v8 = vadd.f32 %v1554_v31, %v854_v16  ;;  %v1010_v16 = vadd.f32 %v1545_v21, %v839_v52 }
 0x28b   :  { %v1556_v22 = vpop.f32.mrf.mxu1 }
 0x28c   :  { %v1557_v38 = vadd.f32 %v1556_v22, %v1555_v56 }
 0x28d   :  { %v1063_v23 = vpop.f32.mrf.mxu1 }
 0x28e   :  { %v1064_v41 = vadd.f32 %v1063_v23, %v991_v24  ;;  %v1026_v44 = vadd.f32 %v1557_v38, %v859_v46  ;;  %v1015_v24 = vadd.f32 %v1548_v37, %v2372_v15  ;;  %v1007_v46 = vadd.f32 %v2370_v45, %v2374_v13  ;;  %v1795_v45 = vld [vmem:[%s2420_s5] sm:$0xff]   ;;  %v1796_v13 = vld [vmem:[%s2420_s5 + $0x8] sm:$0xff]  }
 0x28f   :  { %v1682_v25 = vpop.f32.mrf.mxu1  ;;  %v1799_v37 = vld [vmem:[%s2422_s7 + $0x8] ss:$0 sps:$4 sm:$0x11]  }
 0x290   :  { %v1102_v4 = vmax.f32 %v1064_v41, 0.0  ;;  %v1797_v41 = vld [vmem:[%s2420_s5 + $0x10] ss:$0 sps:$4 sm:$0x77]  }
 0x291   :  { %v1066_v59 = vpop.f32.mrf.mxu1 }
 0x292   :  { %v1067_v18 = vadd.f32 %v1066_v59, %v994_v32  ;;  %v1798_v32 = vld [vmem:[%s2422_s7] sm:$0xff]  }
 0x293   :  { %v1683_v28 = vpop.f32.mrf.mxu1 }
 0x294   :  { %v1103_v36 = vmax.f32 %v1067_v18, 0.0 }
 0x295   :  { %v1071_v39 = vpop.f32.mrf.mxu1 }
 0x296   :  { %v1112_v43 = vpack.c.bf16 %v1103_v36, %v1102_v4  ;;  %v1072_v58 = vadd.f32 %v1071_v39, %v999_v9  ;;  %v1150_v4 = vpop.permute.xlu0 %1149 }
 0x297   :  { %v1686_v57 = vpop.f32.mrf.mxu1 }
 0x298   :  { %v1104_v53 = vmax.f32 %v1072_v58, 0.0  ;;  %v1140_v58 = vpop.permute.xlu1 %1139 }
 0x299   :  { %v1074_v35 = vpop.f32.mrf.mxu1 }
 0x29a   :  { %v1075_v62 = vadd.f32 %v1074_v35, %v1002_v61  ;;  %v1145_v9 = vpop.permute.xlu0 %1144 }
 0x29b   :  { %v1687_v63 = vpop.f32.mrf.mxu1 }
 0x29c   :  { %v1105_v54 = vmax.f32 %v1075_v62, 0.0 }
 0x29d   :  { %v1079_v2 = vpop.f32.mrf.mxu1 }
 0x29e   :  { %v1113_v3 = vpack.c.bf16 %v1105_v54, %v1104_v53  ;;  %v1080_v48 = vadd.f32 %v1079_v2, %v1007_v46  ;;  %v1135_v54 = vpop.permute.xlu0 %1134 }
 0x29f   :  { %v1690_v27 = vpop.f32.mrf.mxu1 }
 0x2a0   :  { %v1106_v25 = vmax.f32 %v1080_v48, 0.0 }
 0x2a1   :  { %v1082_v30 = vpop.f32.mrf.mxu1 }
 0x2a2   :  { %v1083_v40 = vadd.f32 %v1082_v30, %v1010_v16  ;;  %v1254_v21 = vpop.permute.xlu0 %1253 }
 0x2a3   :  { %v1691_v33 = vpop.f32.mrf.mxu1 }
 0x2a4   :  { %v1107_v15 = vmax.f32 %v1083_v40, 0.0  ;;  %v1130_v33 = vpop.permute.xlu1 %1129 }
 0x2a5   :  { %v1087_v26 = vpop.f32.mrf.mxu1 }
 0x2a6   :  { %v1088_v60 = vadd.f32 %v1087_v26, %v1015_v24  ;;  %v1114_v52 = vpack.c.bf16 %v1107_v15, %v1106_v25  ;;  %v1343_v46 = vpop.permute.xlu0 %1342 }
 0x2a7   :  { %v1694_v5 = vpop.f32.mrf.mxu1 }
 0x2a8   :  { %v1108_v19 = vmax.f32 %v1088_v60, 0.0 }
 0x2a9   :  { %v1090_v6 = vpop.f32.mrf.mxu1 }
 0x2aa   :  { %v1091_v17 = vadd.f32 %v1090_v6, %v1018_v10 }
 0x2ab   :  { %v1695_v29 = vpop.f32.mrf.mxu1 }
 0x2ac   :  { %v1109_v47 = vmax.f32 %v1091_v17, 0.0 }
 0x2ad   :  { %v1095_v49 = vpop.f32.mrf.mxu1 }
 0x2ae   :  { %v1096_v12 = vadd.f32 %v1095_v49, %v1023_v8  ;;  %v1115_v55 = vpack.c.bf16 %v1109_v47, %v1108_v19 }
 0x2af   :  { %v1698_v11 = vpop.f32.mrf.mxu1 }
 0x2b0   :  { %v1110_v51 = vmax.f32 %v1096_v12, 0.0  ;;  %v1264_v12 = vpop.permute.xlu1 %1263 }
 0x2b1   :  { %v1098_v14 = vpop.f32.mrf.mxu1 }
 0x2b2   :  { %v1099_v50 = vadd.f32 %v1098_v14, %v1026_v44 }
 0x2b3   :  { %v1699_v23 = vpop.f32.mrf.mxu1 }
 0x2b4   :  { %v1111_v56 = vmax.f32 %v1099_v50, 0.0  ;;  %v1259_v24 = vpop.permute.xlu1 %1258 }
 0x2b6   :  { %v1116_v22 = vpack.c.bf16 %v1111_v56, %v1110_v51 }
 0x2b8   :  { %v1179_v0 = vand.u32 %v1177_v20, %v1116_v22  ;;  %v1338_v22 = vld [vmem:[%s2424_s9] sm:$0x7] }
 0x2ba   :  { %1701 = vmatpush3.bf16.msra.mxu1 %v1179_v0 }
 0x2bb   :  { %1702 = vmatprep.subr.bf16.mxu1 %v1822_v1 }
 0x2be   :  { %1703 = vmatpush3.bf16.msra.mxu1 %v1115_v55 }
 0x2bf   :  { %1704 = vmatprep.subr.bf16.mxu1 %v1822_v1 }
 0x2c2   :  { %1705 = vmatpush3.bf16.msra.mxu1 %v1114_v52 }
 0x2c3   :  { %1706 = vmatprep.subr.bf16.mxu1 %v1822_v1 }
 0x2c6   :  { %1707 = vmatpush3.bf16.msra.mxu1 %v1113_v3 }
 0x2c7   :  { %1708 = vmatprep.subr.bf16.mxu1 %v1822_v1 }
 0x2ca   :  { %1709 = vmatpush3.bf16.msra.mxu1 %v1112_v43 }
 0x2cd   :  { %1711 = vmatmul.mubr.msk.bf16.vlgmr.msra.gmra.mxu1 %vm1165_vm5, %v1795_v45 }
 0x2ce   :  { %1714 = vmatprep.mubr.msk.bf16.mxu1 %vm1823_vm1, %v1822_v1 }
 0x2d5   :  { %1715 = vmatmul.mubr.msk.bf16.gmra.mxu1 %vm1165_vm5, %v1796_v13 }
 0x2d6   :  { %1718 = vmatprep.mubr.msk.bf16.mxu1 %vm1823_vm1, %v1822_v1 }
 0x2dd   :  { %1719 = vmatmul.mubr.msk.bf16.gmra.mxu1 %vm1165_vm5, %v1797_v41 }
 0x2de   :  { %1728 = vmatprep.mubr.msk.bf16.mxu1 %vm1274_vm6, %v1798_v32 }
 0x38d   :  { %v1215_v59 = vpop.f32.mrf.mxu1 }
 0x38e   :  { %v1216_v5 = vadd.f32 %v1215_v59, %v1130_v33 }
 0x38f   :  { %v1712_v18 = vpop.f32.mrf.mxu1 }
 0x390   :  { %v1237_v8 = vmax.f32 %v1216_v5, 0.0 }
 0x391   :  { %v1218_v28 = vpop.f32.mrf.mxu1 }
 0x392   :  { %v1219_v3 = vadd.f32 %v1218_v28, %v1135_v54 }
 0x393   :  { %v1713_v36 = vpop.f32.mrf.mxu1 }
 0x394   :  { %v1238_v38 = vmax.f32 %v1219_v3, 0.0 }
 0x395   :  { %v1223_v39 = vpop.f32.mrf.mxu1 }
 0x396   :  { %v1224_v63 = vadd.f32 %v1223_v39, %v1140_v58  ;;  %v1242_v11 = vpack.c.bf16 %v1238_v38, %v1237_v8 }
 0x397   :  { %v1716_v43 = vpop.f32.mrf.mxu1 }
 0x398   :  { %v1239_v6 = vmax.f32 %v1224_v63, 0.0 }
 0x399   :  { %v1226_v57 = vpop.f32.mrf.mxu1 }
 0x39a   :  { %v1227_v35 = vadd.f32 %v1226_v57, %v1145_v9 }
 0x39b   :  { %v1717_v61 = vpop.f32.mrf.mxu1 }
 0x39c   :  { %v1240_v27 = vmax.f32 %v1227_v35, 0.0 }
 0x39d   :  { %v1231_v62 = vpop.f32.mrf.mxu1 }
 0x39e   :  { %v1232_v53 = vadd.f32 %v1231_v62, %v1150_v4  ;;  %v1243_v49 = vpack.c.bf16 %v1240_v27, %v1239_v6 }
 0x39f   :  { %v1720_v2 = vpop.f32.mrf.mxu1 }
 0x3a0   :  { %v1241_v30 = vmax.f32 %v1232_v53, 0.0 }
 0x3a1   :  { %v1234_v26 = vpop.f32.mrf.mxu1 }
 0x3a2   :  { %v1244_v31 = vpack.c.bf16 %v1241_v30, %v1241_v30 }
 0x3a3   :  { %v1721_v29 = vpop.f32.mrf.mxu1 }
 0x3a4   :  { %1740 = vmatprep.subr.msk.bf16.mxu1 %vm1281_vm7, %v1244_v31  ;;  %v1283_v7 = vsel %vm1281_vm7, %v1244_v31, 0 }
 0x3a5   :  { %1723 = vmatpush3.bf16.msra.mxu1 %v1283_v7 }
 0x3a6   :  { %1724 = vmatprep.subr.bf16.mxu1 %v1243_v49 }
 0x3a9   :  { %1725 = vmatpush3.bf16.msra.mxu1 %v1243_v49 }
 0x3aa   :  { %1726 = vmatprep.subr.bf16.mxu1 %v1242_v11 }
 0x3ad   :  { %1727 = vmatpush3.bf16.msra.mxu1 %v1242_v11 }
 0x3ae   :  { %1732 = vmatprep.subr.bf16.mxu1 %v1822_v1 }
 0x3b0   :  { %1729 = vmatmul.mubr.msk.bf16.vlgmr.msra.gmra.mxu1 %vm1274_vm6, %v1799_v37 }
 0x3b1   :  { %1736 = vmatprep.mubr.msk.bf16.mxu1 %vm1823_vm1, %v1822_v1 }
 0x470   :  { %v1730_v44 = vpop.f32.mrf.mxu1 }
 0x471   :  { %v1328_v14 = vadd.f32 %v1730_v44, %v1264_v12 }
 0x472   :  { %v1319_v34 = vpop.f32.mrf.mxu1 }
 0x473   :  { %v1335_v42 = vmax.f32 %v1328_v14, 0.0  ;;  %v1320_v23 = vadd.f32 %v1319_v34, %v1254_v21 }
 0x474   :  { %v1731_v10 = vpop.f32.mrf.mxu1 }
 0x475   :  { %v1337_v50 = vpack.c.bf16 %v1335_v42, %v1335_v42  ;;  %v1333_v20 = vmax.f32 %v1320_v23, 0.0 }
 0x476   :  { %v1322_v17 = vpop.f32.mrf.mxu1 }
 0x477   :  { %v1323_v51 = vadd.f32 %v1322_v17, %v1259_v24  ;;  %v1351_v56 = vsel %vm1349_vm8, %v1337_v50, 0 }
 0x478   :  { %1733 = vmatpush3.bf16.msra.mxu1 %v1351_v56 }
 0x479   :  { %v1334_v16 = vmax.f32 %v1323_v51, 0.0  ;;  %1734 = vmatprep.subr.bf16.mxu1 %v1822_v1 }
 0x47b   :  { %v1336_v60 = vpack.c.bf16 %v1334_v16, %v1333_v20 }
 0x47d   :  { %1735 = vmatpush3.bf16.msra.mxu1 %v1336_v60 }
 0x480   :  { %1737 = vmatmul.mubr.msk.bf16.vlgmr.msra.gmra.mxu1 %vm1345_vm9, %v1338_v22 }
 0x540   :  { %v1387_v40 = vpop.f32.mrf.mxu1 }
 0x541   :  { %v1388_v47 = vadd.f32 %v1387_v40, %v1343_v46 }
 0x542   :  { %v1738_v0 = vpop.f32.mrf.mxu1 }
 0x543   :  { %1393 = vst [vmem:[#allocation2] sm:$0x3f] %v1388_v47 }
 0x544   :  { %v1390_v48 = vpop.f32.mrf.mxu1 }
 0x545   :  { %1811 = shalt.err (!%p1808_p4)
}
 0x546   :  { %1403 = dma.vmem_to_hbm [thread:$0]  %s1401_s0, 128, %s2426_s11, [#allocation3]   ;;  %v1739_v1 = vpop.f32.mrf.mxu1 }
 0x547   :  { %1820 = dma.done.wait [#allocation3], 128  }
 0x548   :  { %1821 = vsyncadd [#allocation3], 4294967168 }
 0x549   :  { %1407 = vsyncpa [#allocation3], 1 }

</bundles_post_ra>
